<compile_context>
chip_gen: v7x
topology: tpu7x:2x2x1
jax: 0.10.0
libtpu: 0.0.40
codegen_flags: <defaults>
</compile_context>

<pallas_src>
import jax
import jax.numpy as jnp
import numpy as np
from jax.experimental import pallas as pl
from jax.experimental.pallas import tpu as pltpu  # noqa: F401  (TPU backend)

# ----------------------- synthetic module config -----------------------
B            = 2                      # batch
X_DIM        = 16                     # dim of x passed to forward
PROTO_DIM    = 16                     # dim of proto_feature
BOTTLENECK   = X_DIM + PROTO_DIM      # opt.bottleneck_size (must match concat width)
DIM_TEMPLATE = 2                      # opt.dim_template (2D template)
HIDDEN       = 32                     # opt.hidden_neurons
NUM_LAYERS   = 2                      # opt.num_layers
NUM_SLAVES   = 2                      # num_primitives
N_PER_SLAVE  = 128                    # ttl_point // num_primitives
TTL_POINT    = NUM_SLAVES * N_PER_SLAVE
EPS          = 1e-5                   # BatchNorm eps

D_PAD     = 8                         # pad template dim (2 -> 8) with zeros (exact)
OUT_PAD   = 8                         # pad output channels (3 -> 8) with zeros (exact)
NUM_CHAIN = NUM_LAYERS + 2            # conv2 + conv_list + last_conv
BN_LANES  = B * N_PER_SLAVE           # batch fused onto the 256-wide lane axis

assert BOTTLENECK == HIDDEN, "weight-slab packing assumes bottleneck == hidden"


# ----------------------------- Pallas kernel -----------------------------
def cluster_kernel(pts_ref, lat_ref, w1_ref, wc_ref, bc_ref, out_ref):
    # pts_ref : (S, D_PAD, B*N)       bf16  template points, channels-first,
    #                                       tiled along the lane axis per batch
    # lat_ref : (S, C, B*N)           f32   BN1-scaled latent + folded conv1/BN1 bias
    # w1_ref  : (S, C, D_PAD)         bf16  conv1 weight with BN1 scale folded
    # wc_ref  : (S, NUM_CHAIN, H, H)  bf16  conv2 / conv_list / last_conv (BN folded,
    #                                       last_conv zero-padded to H rows)
    # bc_ref  : (S, NUM_CHAIN, H, 1)  f32   matching folded biases
    # out_ref : (B, OUT_PAD, S*N)     f32   final layout (channels, point axis by slave)
    for s in range(NUM_SLAVES):
        # conv1 + BN1 + latent + relu (batch handled by the fused 256-lane axis)
        h = jnp.dot(w1_ref[s], pts_ref[s], preferred_element_type=jnp.float32)
        h = jnp.maximum(h + lat_ref[s], 0.0)                       # (C, B*N) f32

        # conv2 + hidden stack (BN folded), relu
        for i in range(NUM_CHAIN - 1):
            h = jnp.dot(wc_ref[s, i], h.astype(jnp.bfloat16),
                        preferred_element_type=jnp.float32) + bc_ref[s, i]
            h = jnp.maximum(h, 0.0)                                # (H, B*N) f32

        # last conv + tanh (weight rows >= 3 are zero-padded)
        o = jnp.tanh(jnp.dot(wc_ref[s, NUM_CHAIN - 1], h.astype(jnp.bfloat16),
                             preferred_element_type=jnp.float32)
                     + bc_ref[s, NUM_CHAIN - 1])                   # (H, B*N)

        # scatter into the final (B, C, ttl_point) layout: unmasked (8, 128) stores
        for b in range(B):
            out_ref[b, :, s * N_PER_SLAVE:(s + 1) * N_PER_SLAVE] = (
                o[:OUT_PAD, b * N_PER_SLAVE:(b + 1) * N_PER_SLAVE])


# ---------------------- BN / bias folding (exact) -----------------------
def fold_params(params, latent):
    """Fold eval-mode BatchNorm + conv bias into affine weights.

    Channels-first (C_out, C_in) layout == PyTorch Conv1d weight layout.
    Returns: w1 (S,C,D), lat (S,B,C), w2 (S,H,C), b2 (S,H),
             wL (S,L,H,H), bL (S,L,H), wo (S,3,H), bo (S,3).
    """
    s1 = params['g1'] / jnp.sqrt(params['v1'] + EPS)                      # (S, C)
    w1 = params['W1'] * s1[:, :, None]                                    # (S, C, D)
    b1 = (params['b1'] - params['m1']) * s1 + params['be1']               # (S, C)
    # latent is added before BN1 -> it gets scaled by the BN1 scale as well
    lat = b1[:, None, :] + s1[:, None, :] * latent[None, :, :]            # (S, B, C)

    s2 = params['g2'] / jnp.sqrt(params['v2'] + EPS)
    w2 = params['W2'] * s2[:, :, None]                                    # (S, H, C)
    b2 = (params['b2'] - params['m2']) * s2 + params['be2']               # (S, H)

    sL = params['gL'] / jnp.sqrt(params['vL'] + EPS)
    wL = params['WL'] * sL[..., None]                                     # (S, L, H, H)
    bL = (params['bL'] - params['mL']) * sL + params['beL']               # (S, L, H)

    return w1, lat, w2, b2, wL, bL, params['Wo'], params['bo']


# ------------------------------ wrapper ---------------------------------
def proto2d_to_3d_cluster(pts, latent, params):
    """pts: (S, N, DIM_TEMPLATE)  latent: (B, BOTTLENECK)  ->  (B, 3, TTL_POINT)."""
    w1, lat, w2, b2, wL, bL, wo, bo = fold_params(params, latent)

    # points: (S, D, N) channels-first, pad D to 8, tile batch onto the lane axis
    pts_cf = jnp.swapaxes(pts, 1, 2)                                       # (S, D, N)
    pts_cf = jnp.pad(pts_cf, ((0, 0), (0, D_PAD - DIM_TEMPLATE), (0, 0)))
    pts_t = jnp.tile(pts_cf, (1, 1, B)).astype(jnp.bfloat16)               # (S, 8, B*N)

    # conv1 weight, D padded (padded rows of pts are zero -> exact)
    w1_p = jnp.pad(w1, ((0, 0), (0, 0),
                        (0, D_PAD - DIM_TEMPLATE))).astype(jnp.bfloat16)   # (S, C, 8)

    # (conv1/BN1 bias + scaled latent) broadcast along points, batch on lanes
    lat_slab = jnp.broadcast_to(
        jnp.swapaxes(lat, 1, 2)[:, :, :, None],
        (NUM_SLAVES, BOTTLENECK, B, N_PER_SLAVE)
    ).reshape(NUM_SLAVES, BOTTLENECK, BN_LANES)                            # (S, C, B*N) f32

    # pack conv2 / conv_list / last_conv into one weight slab + one bias slab
    wo_p = jnp.pad(wo, ((0, 0), (0, HIDDEN - 3), (0, 0)))                  # (S, H, H)
    bo_p = jnp.pad(bo, ((0, 0), (0, HIDDEN - 3)))                          # (S, H)
    wc = jnp.concatenate([w2[:, None], wL, wo_p[:, None]],
                         axis=1).astype(jnp.bfloat16)                      # (S, NC, H, H)
    bc = jnp.concatenate([b2[:, None], bL, bo_p[:, None]],
                         axis=1)[..., None]                                # (S, NC, H, 1)

    # single-step pallas_call: whole arrays resident in VMEM (no grid, no per-step DMA)
    out = pl.pallas_call(
        cluster_kernel,
        out_shape=jax.ShapeDtypeStruct((B, OUT_PAD, TTL_POINT), jnp.float32),
    )(pts_t, lat_slab, w1_p, wc, bc)

    return out[:, :3, :]                                                   # drop channel pad


# ------------------------- pure-JAX references --------------------------
def reference_folded(pts, latent, params, use_bf16=True):
    """Same folded math as the kernel, in plain channels-last JAX."""
    w1, lat, w2, b2, wL, bL, wo, bo = fold_params(params, latent)
    if use_bf16:
        def mm(a, b):
            return jnp.dot(a.astype(jnp.bfloat16), b.astype(jnp.bfloat16),
                           preferred_element_type=jnp.float32)
    else:
        def mm(a, b):
            return jnp.dot(a, b, preferred_element_type=jnp.float32,
                           precision=jax.lax.Precision.HIGHEST)

    outs = []
    for s in range(NUM_SLAVES):
        p = pts[s]                                                        # (N, D)
        h = mm(p, w1[s].T)[None] + lat[s][:, None, :]                     # (B, N, C)
        h = jnp.maximum(h, 0.0)
        h = jnp.maximum(mm(h.reshape(-1, BOTTLENECK), w2[s].T) + b2[s], 0.0)
        h = h.reshape(B, N_PER_SLAVE, HIDDEN)
        for i in range(NUM_LAYERS):
            h = jnp.maximum(mm(h.reshape(-1, HIDDEN), wL[s, i].T) + bL[s, i], 0.0)
            h = h.reshape(B, N_PER_SLAVE, HIDDEN)
        o = jnp.tanh(mm(h.reshape(-1, HIDDEN), wo[s].T) + bo[s])
        outs.append(o.reshape(B, N_PER_SLAVE, 3))
    out = jnp.stack(outs, 0)                                              # (S, B, N, 3)
    return jnp.transpose(out, (1, 3, 0, 2)).reshape(B, 3, TTL_POINT)


def reference_torch(pts, latent, params):
    """Direct f32 transcription of the PyTorch eval-mode forward (unfolded BN)."""
    hp = jax.lax.Precision.HIGHEST

    def mm(a, b):
        return jnp.dot(a, b, preferred_element_type=jnp.float32, precision=hp)

    def bn(h, g, be, m, v):
        return (h - m) / jnp.sqrt(v + EPS) * g + be

    outs = []
    for s in range(NUM_SLAVES):
        p = pts[s]                                                        # (N, D)
        h = mm(p, params['W1'][s].T) + params['b1'][s]                    # (N, C)
        h = h[None] + latent[:, None, :]                                  # (B, N, C)
        h = jnp.maximum(bn(h, params['g1'][s], params['be1'][s],
                           params['m1'][s], params['v1'][s]), 0.0)
        h = mm(h.reshape(-1, BOTTLENECK), params['W2'][s].T) + params['b2'][s]
        h = h.reshape(B, N_PER_SLAVE, HIDDEN)
        h = jnp.maximum(bn(h, params['g2'][s], params['be2'][s],
                           params['m2'][s], params['v2'][s]), 0.0)
        for i in range(NUM_LAYERS):
            h = mm(h.reshape(-1, HIDDEN), params['WL'][s, i].T) + params['bL'][s, i]
            h = h.reshape(B, N_PER_SLAVE, HIDDEN)
            h = jnp.maximum(bn(h, params['gL'][s, i], params['beL'][s, i],
                               params['mL'][s, i], params['vL'][s, i]), 0.0)
        o = jnp.tanh(mm(h.reshape(-1, HIDDEN), params['Wo'][s].T) + params['bo'][s])
        outs.append(o.reshape(B, N_PER_SLAVE, 3))
    out = jnp.stack(outs, 0)                                              # (S, B, N, 3)
    return jnp.transpose(out, (1, 3, 0, 2)).reshape(B, 3, TTL_POINT)


# ------------------------------- main ----------------------------------
if __name__ == "__main__":
    key = jax.random.PRNGKey(0)
    ks = iter(jax.random.split(key, 40))

    def nrm(shape, scale=0.2):
        return (scale * jax.random.normal(next(ks), shape)).astype(jnp.float32)

    def uni(shape, lo, hi):
        return jax.random.uniform(next(ks), shape, jnp.float32, lo, hi)

    # deterministic synthetic parameters (PyTorch Conv1d weight layout: (out, in))
    params = dict(
        W1=nrm((NUM_SLAVES, BOTTLENECK, DIM_TEMPLATE)), b1=nrm((NUM_SLAVES, BOTTLENECK), 0.1),
        g1=uni((NUM_SLAVES, BOTTLENECK), 0.8, 1.2), be1=nrm((NUM_SLAVES, BOTTLENECK), 0.1),
        m1=nrm((NUM_SLAVES, BOTTLENECK), 0.1), v1=uni((NUM_SLAVES, BOTTLENECK), 0.5, 1.5),
        W2=nrm((NUM_SLAVES, HIDDEN, BOTTLENECK)), b2=nrm((NUM_SLAVES, HIDDEN), 0.1),
        g2=uni((NUM_SLAVES, HIDDEN), 0.8, 1.2), be2=nrm((NUM_SLAVES, HIDDEN), 0.1),
        m2=nrm((NUM_SLAVES, HIDDEN), 0.1), v2=uni((NUM_SLAVES, HIDDEN), 0.5, 1.5),
        WL=nrm((NUM_SLAVES, NUM_LAYERS, HIDDEN, HIDDEN)),
        bL=nrm((NUM_SLAVES, NUM_LAYERS, HIDDEN), 0.1),
        gL=uni((NUM_SLAVES, NUM_LAYERS, HIDDEN), 0.8, 1.2),
        beL=nrm((NUM_SLAVES, NUM_LAYERS, HIDDEN), 0.1),
        mL=nrm((NUM_SLAVES, NUM_LAYERS, HIDDEN), 0.1),
        vL=uni((NUM_SLAVES, NUM_LAYERS, HIDDEN), 0.5, 1.5),
        Wo=nrm((NUM_SLAVES, 3, HIDDEN)), bo=nrm((NUM_SLAVES, 3), 0.1),
    )

    # inputs of the cluster forward
    x = nrm((B, X_DIM), 1.0)                                   # network feature x
    proto = nrm((1, PROTO_DIM), 1.0)                           # self.proto_feat
    latent = jnp.concatenate([x, jnp.tile(proto, (B, 1))], axis=1)   # (B, BOTTLENECK)
    # template.get_random_points -> uniform 2D samples in [-1, 1]
    pts = jax.random.uniform(next(ks), (NUM_SLAVES, N_PER_SLAVE, DIM_TEMPLATE),
                             jnp.float32, -1.0, 1.0)

    out = jax.block_until_ready(proto2d_to_3d_cluster(pts, latent, params))
    assert out.shape == (B, 3, TTL_POINT), out.shape

    # (a) BN/bias/latent folding is an exact algebraic rewrite (pure-f32 check)
    ref_fold_f32 = reference_folded(pts, latent, params, use_bf16=False)
    ref_torch = reference_torch(pts, latent, params)
    np.testing.assert_allclose(np.asarray(ref_fold_f32), np.asarray(ref_torch),
                               atol=1e-4, rtol=1e-4)
    # (b) kernel matches the folded math at matched (bf16-matmul) precision
    ref_fold_bf16 = reference_folded(pts, latent, params, use_bf16=True)
    np.testing.assert_allclose(np.asarray(out), np.asarray(ref_fold_bf16),
                               atol=2e-3, rtol=2e-3)
    # (c) end-to-end vs the f32 PyTorch-semantics reference (loose: bf16 MXU matmuls)
    np.testing.assert_allclose(np.asarray(out), np.asarray(ref_torch),
                               atol=5e-2, rtol=5e-2)

    print("KERNEL_OK")
</pallas_src>

<mosaic_0001>
module attributes {stable_mosaic.version = 11 : i64} {
  func.func @cluster_kernel(%arg0: memref<2x8x256xbf16, #tpu.memory_space<vmem>>, %arg1: memref<2x32x256xf32, #tpu.memory_space<vmem>>, %arg2: memref<2x32x8xbf16, #tpu.memory_space<vmem>>, %arg3: memref<2x4x32x32xbf16, #tpu.memory_space<vmem>>, %arg4: memref<2x4x32x1xf32, #tpu.memory_space<vmem>>, %arg5: memref<2x8x256xf32, #tpu.memory_space<vmem>>) attributes {dimension_semantics = [], scalar_prefetch = 0 : i64, scratch_operands = 0 : i64, tpu.core_type = #tpu.core_type<tc>} {
    %c0 = arith.constant 0 : index
    %c0_0 = arith.constant 0 : index
    %c0_1 = arith.constant 0 : index
    %0 = vector.load %arg2[%c0, %c0_0, %c0_1] : memref<2x32x8xbf16, #tpu.memory_space<vmem>>, vector<1x32x8xbf16>
    %1 = vector.shape_cast %0 : vector<1x32x8xbf16> to vector<32x8xbf16>
    %c0_2 = arith.constant 0 : index
    %c0_3 = arith.constant 0 : index
    %c0_4 = arith.constant 0 : index
    %2 = vector.load %arg0[%c0_2, %c0_3, %c0_4] : memref<2x8x256xbf16, #tpu.memory_space<vmem>>, vector<1x8x256xbf16>
    %3 = vector.shape_cast %2 : vector<1x8x256xbf16> to vector<8x256xbf16>
    %cst = arith.constant dense<0.000000e+00> : vector<32x256xf32>
    %4 = tpu.matmul %1, %3, %cst {dimension_numbers = #tpu.dot_dimension_numbers<[1], [0], [0], [1], [0, 0, 1, 1], [], []>} : vector<32x8xbf16>, vector<8x256xbf16>, vector<32x256xf32> -> vector<32x256xf32>
    %c0_5 = arith.constant 0 : index
    %c0_6 = arith.constant 0 : index
    %c0_7 = arith.constant 0 : index
    %5 = vector.load %arg1[%c0_5, %c0_6, %c0_7] : memref<2x32x256xf32, #tpu.memory_space<vmem>>, vector<1x32x256xf32>
    %6 = vector.shape_cast %5 : vector<1x32x256xf32> to vector<32x256xf32>
    %7 = arith.addf %4, %6 : vector<32x256xf32>
    %cst_8 = arith.constant 0.000000e+00 : f32
    %8 = vector.broadcast %cst_8 : f32 to vector<32x256xf32>
    %9 = arith.maximumf %7, %8 : vector<32x256xf32>
    %c0_9 = arith.constant 0 : index
    %c0_10 = arith.constant 0 : index
    %c0_11 = arith.constant 0 : index
    %c0_12 = arith.constant 0 : index
    %10 = vector.load %arg3[%c0_9, %c0_10, %c0_11, %c0_12] : memref<2x4x32x32xbf16, #tpu.memory_space<vmem>>, vector<1x1x32x32xbf16>
    %11 = vector.shape_cast %10 : vector<1x1x32x32xbf16> to vector<32x32xbf16>
    %12 = arith.truncf %9 : vector<32x256xf32> to vector<32x256xbf16>
    %cst_13 = arith.constant dense<0.000000e+00> : vector<32x256xf32>
    %13 = tpu.matmul %11, %12, %cst_13 {dimension_numbers = #tpu.dot_dimension_numbers<[1], [0], [0], [1], [0, 0, 1, 1], [], []>} : vector<32x32xbf16>, vector<32x256xbf16>, vector<32x256xf32> -> vector<32x256xf32>
    %c0_14 = arith.constant 0 : index
    %c0_15 = arith.constant 0 : index
    %c0_16 = arith.constant 0 : index
    %c0_17 = arith.constant 0 : index
    %14 = vector.load %arg4[%c0_14, %c0_15, %c0_16, %c0_17] : memref<2x4x32x1xf32, #tpu.memory_space<vmem>>, vector<1x1x32x1xf32>
    %15 = vector.shape_cast %14 : vector<1x1x32x1xf32> to vector<32x1xf32>
    %16 = vector.broadcast %15 : vector<32x1xf32> to vector<32x256xf32>
    %17 = arith.addf %13, %16 : vector<32x256xf32>
    %cst_18 = arith.constant 0.000000e+00 : f32
    %18 = vector.broadcast %cst_18 : f32 to vector<32x256xf32>
    %19 = arith.maximumf %17, %18 : vector<32x256xf32>
    %c0_19 = arith.constant 0 : index
    %c1 = arith.constant 1 : index
    %c0_20 = arith.constant 0 : index
    %c0_21 = arith.constant 0 : index
    %20 = vector.load %arg3[%c0_19, %c1, %c0_20, %c0_21] : memref<2x4x32x32xbf16, #tpu.memory_space<vmem>>, vector<1x1x32x32xbf16>
    %21 = vector.shape_cast %20 : vector<1x1x32x32xbf16> to vector<32x32xbf16>
    %22 = arith.truncf %19 : vector<32x256xf32> to vector<32x256xbf16>
    %cst_22 = arith.constant dense<0.000000e+00> : vector<32x256xf32>
    %23 = tpu.matmul %21, %22, %cst_22 {dimension_numbers = #tpu.dot_dimension_numbers<[1], [0], [0], [1], [0, 0, 1, 1], [], []>} : vector<32x32xbf16>, vector<32x256xbf16>, vector<32x256xf32> -> vector<32x256xf32>
    %c0_23 = arith.constant 0 : index
    %c1_24 = arith.constant 1 : index
    %c0_25 = arith.constant 0 : index
    %c0_26 = arith.constant 0 : index
    %24 = vector.load %arg4[%c0_23, %c1_24, %c0_25, %c0_26] : memref<2x4x32x1xf32, #tpu.memory_space<vmem>>, vector<1x1x32x1xf32>
    %25 = vector.shape_cast %24 : vector<1x1x32x1xf32> to vector<32x1xf32>
    %26 = vector.broadcast %25 : vector<32x1xf32> to vector<32x256xf32>
    %27 = arith.addf %23, %26 : vector<32x256xf32>
    %cst_27 = arith.constant 0.000000e+00 : f32
    %28 = vector.broadcast %cst_27 : f32 to vector<32x256xf32>
    %29 = arith.maximumf %27, %28 : vector<32x256xf32>
    %c0_28 = arith.constant 0 : index
    %c2 = arith.constant 2 : index
    %c0_29 = arith.constant 0 : index
    %c0_30 = arith.constant 0 : index
    %30 = vector.load %arg3[%c0_28, %c2, %c0_29, %c0_30] : memref<2x4x32x32xbf16, #tpu.memory_space<vmem>>, vector<1x1x32x32xbf16>
    %31 = vector.shape_cast %30 : vector<1x1x32x32xbf16> to vector<32x32xbf16>
    %32 = arith.truncf %29 : vector<32x256xf32> to vector<32x256xbf16>
    %cst_31 = arith.constant dense<0.000000e+00> : vector<32x256xf32>
    %33 = tpu.matmul %31, %32, %cst_31 {dimension_numbers = #tpu.dot_dimension_numbers<[1], [0], [0], [1], [0, 0, 1, 1], [], []>} : vector<32x32xbf16>, vector<32x256xbf16>, vector<32x256xf32> -> vector<32x256xf32>
    %c0_32 = arith.constant 0 : index
    %c2_33 = arith.constant 2 : index
    %c0_34 = arith.constant 0 : index
    %c0_35 = arith.constant 0 : index
    %34 = vector.load %arg4[%c0_32, %c2_33, %c0_34, %c0_35] : memref<2x4x32x1xf32, #tpu.memory_space<vmem>>, vector<1x1x32x1xf32>
    %35 = vector.shape_cast %34 : vector<1x1x32x1xf32> to vector<32x1xf32>
    %36 = vector.broadcast %35 : vector<32x1xf32> to vector<32x256xf32>
    %37 = arith.addf %33, %36 : vector<32x256xf32>
    %cst_36 = arith.constant 0.000000e+00 : f32
    %38 = vector.broadcast %cst_36 : f32 to vector<32x256xf32>
    %39 = arith.maximumf %37, %38 : vector<32x256xf32>
    %c0_37 = arith.constant 0 : index
    %c3 = arith.constant 3 : index
    %c0_38 = arith.constant 0 : index
    %c0_39 = arith.constant 0 : index
    %40 = vector.load %arg3[%c0_37, %c3, %c0_38, %c0_39] : memref<2x4x32x32xbf16, #tpu.memory_space<vmem>>, vector<1x1x32x32xbf16>
    %41 = vector.shape_cast %40 : vector<1x1x32x32xbf16> to vector<32x32xbf16>
    %42 = arith.truncf %39 : vector<32x256xf32> to vector<32x256xbf16>
    %cst_40 = arith.constant dense<0.000000e+00> : vector<32x256xf32>
    %43 = tpu.matmul %41, %42, %cst_40 {dimension_numbers = #tpu.dot_dimension_numbers<[1], [0], [0], [1], [0, 0, 1, 1], [], []>} : vector<32x32xbf16>, vector<32x256xbf16>, vector<32x256xf32> -> vector<32x256xf32>
    %c0_41 = arith.constant 0 : index
    %c3_42 = arith.constant 3 : index
    %c0_43 = arith.constant 0 : index
    %c0_44 = arith.constant 0 : index
    %44 = vector.load %arg4[%c0_41, %c3_42, %c0_43, %c0_44] : memref<2x4x32x1xf32, #tpu.memory_space<vmem>>, vector<1x1x32x1xf32>
    %45 = vector.shape_cast %44 : vector<1x1x32x1xf32> to vector<32x1xf32>
    %46 = vector.broadcast %45 : vector<32x1xf32> to vector<32x256xf32>
    %47 = arith.addf %43, %46 : vector<32x256xf32>
    %48 = math.tanh %47 : vector<32x256xf32>
    %49 = vector.extract_strided_slice %48 {offsets = [0, 0], sizes = [8, 128], strides = [1, 1]} : vector<32x256xf32> to vector<8x128xf32>
    %c0_45 = arith.constant 0 : index
    %c0_46 = arith.constant 0 : index
    %c0_47 = arith.constant 0 : index
    %50 = vector.load %arg5[%c0_45, %c0_46, %c0_47] : memref<2x8x256xf32, #tpu.memory_space<vmem>>, vector<1x8x128xf32>
    %51 = vector.shape_cast %50 : vector<1x8x128xf32> to vector<8x128xf32>
    %52 = vector.shape_cast %49 : vector<8x128xf32> to vector<1x8x128xf32>
    tpu.vector_store %arg5[%c0_45, %c0_46, %c0_47], %52 {strides = array<i32>} : memref<2x8x256xf32, #tpu.memory_space<vmem>>, vector<1x8x128xf32>,
    %53 = vector.extract_strided_slice %48 {offsets = [0, 128], sizes = [8, 128], strides = [1, 1]} : vector<32x256xf32> to vector<8x128xf32>
    %c1_48 = arith.constant 1 : index
    %c0_49 = arith.constant 0 : index
    %c0_50 = arith.constant 0 : index
    %54 = vector.load %arg5[%c1_48, %c0_49, %c0_50] : memref<2x8x256xf32, #tpu.memory_space<vmem>>, vector<1x8x128xf32>
    %55 = vector.shape_cast %54 : vector<1x8x128xf32> to vector<8x128xf32>
    %56 = vector.shape_cast %53 : vector<8x128xf32> to vector<1x8x128xf32>
    tpu.vector_store %arg5[%c1_48, %c0_49, %c0_50], %56 {strides = array<i32>} : memref<2x8x256xf32, #tpu.memory_space<vmem>>, vector<1x8x128xf32>,
    %c1_51 = arith.constant 1 : index
    %c0_52 = arith.constant 0 : index
    %c0_53 = arith.constant 0 : index
    %57 = vector.load %arg2[%c1_51, %c0_52, %c0_53] : memref<2x32x8xbf16, #tpu.memory_space<vmem>>, vector<1x32x8xbf16>
    %58 = vector.shape_cast %57 : vector<1x32x8xbf16> to vector<32x8xbf16>
    %c1_54 = arith.constant 1 : index
    %c0_55 = arith.constant 0 : index
    %c0_56 = arith.constant 0 : index
    %59 = vector.load %arg0[%c1_54, %c0_55, %c0_56] : memref<2x8x256xbf16, #tpu.memory_space<vmem>>, vector<1x8x256xbf16>
    %60 = vector.shape_cast %59 : vector<1x8x256xbf16> to vector<8x256xbf16>
    %cst_57 = arith.constant dense<0.000000e+00> : vector<32x256xf32>
    %61 = tpu.matmul %58, %60, %cst_57 {dimension_numbers = #tpu.dot_dimension_numbers<[1], [0], [0], [1], [0, 0, 1, 1], [], []>} : vector<32x8xbf16>, vector<8x256xbf16>, vector<32x256xf32> -> vector<32x256xf32>
    %c1_58 = arith.constant 1 : index
    %c0_59 = arith.constant 0 : index
    %c0_60 = arith.constant 0 : index
    %62 = vector.load %arg1[%c1_58, %c0_59, %c0_60] : memref<2x32x256xf32, #tpu.memory_space<vmem>>, vector<1x32x256xf32>
    %63 = vector.shape_cast %62 : vector<1x32x256xf32> to vector<32x256xf32>
    %64 = arith.addf %61, %63 : vector<32x256xf32>
    %cst_61 = arith.constant 0.000000e+00 : f32
    %65 = vector.broadcast %cst_61 : f32 to vector<32x256xf32>
    %66 = arith.maximumf %64, %65 : vector<32x256xf32>
    %c1_62 = arith.constant 1 : index
    %c0_63 = arith.constant 0 : index
    %c0_64 = arith.constant 0 : index
    %c0_65 = arith.constant 0 : index
    %67 = vector.load %arg3[%c1_62, %c0_63, %c0_64, %c0_65] : memref<2x4x32x32xbf16, #tpu.memory_space<vmem>>, vector<1x1x32x32xbf16>
    %68 = vector.shape_cast %67 : vector<1x1x32x32xbf16> to vector<32x32xbf16>
    %69 = arith.truncf %66 : vector<32x256xf32> to vector<32x256xbf16>
    %cst_66 = arith.constant dense<0.000000e+00> : vector<32x256xf32>
    %70 = tpu.matmul %68, %69, %cst_66 {dimension_numbers = #tpu.dot_dimension_numbers<[1], [0], [0], [1], [0, 0, 1, 1], [], []>} : vector<32x32xbf16>, vector<32x256xbf16>, vector<32x256xf32> -> vector<32x256xf32>
    %c1_67 = arith.constant 1 : index
    %c0_68 = arith.constant 0 : index
    %c0_69 = arith.constant 0 : index
    %c0_70 = arith.constant 0 : index
    %71 = vector.load %arg4[%c1_67, %c0_68, %c0_69, %c0_70] : memref<2x4x32x1xf32, #tpu.memory_space<vmem>>, vector<1x1x32x1xf32>
    %72 = vector.shape_cast %71 : vector<1x1x32x1xf32> to vector<32x1xf32>
    %73 = vector.broadcast %72 : vector<32x1xf32> to vector<32x256xf32>
    %74 = arith.addf %70, %73 : vector<32x256xf32>
    %cst_71 = arith.constant 0.000000e+00 : f32
    %75 = vector.broadcast %cst_71 : f32 to vector<32x256xf32>
    %76 = arith.maximumf %74, %75 : vector<32x256xf32>
    %c1_72 = arith.constant 1 : index
    %c1_73 = arith.constant 1 : index
    %c0_74 = arith.constant 0 : index
    %c0_75 = arith.constant 0 : index
    %77 = vector.load %arg3[%c1_72, %c1_73, %c0_74, %c0_75] : memref<2x4x32x32xbf16, #tpu.memory_space<vmem>>, vector<1x1x32x32xbf16>
    %78 = vector.shape_cast %77 : vector<1x1x32x32xbf16> to vector<32x32xbf16>
    %79 = arith.truncf %76 : vector<32x256xf32> to vector<32x256xbf16>
    %cst_76 = arith.constant dense<0.000000e+00> : vector<32x256xf32>
    %80 = tpu.matmul %78, %79, %cst_76 {dimension_numbers = #tpu.dot_dimension_numbers<[1], [0], [0], [1], [0, 0, 1, 1], [], []>} : vector<32x32xbf16>, vector<32x256xbf16>, vector<32x256xf32> -> vector<32x256xf32>
    %c1_77 = arith.constant 1 : index
    %c1_78 = arith.constant 1 : index
    %c0_79 = arith.constant 0 : index
    %c0_80 = arith.constant 0 : index
    %81 = vector.load %arg4[%c1_77, %c1_78, %c0_79, %c0_80] : memref<2x4x32x1xf32, #tpu.memory_space<vmem>>, vector<1x1x32x1xf32>
    %82 = vector.shape_cast %81 : vector<1x1x32x1xf32> to vector<32x1xf32>
    %83 = vector.broadcast %82 : vector<32x1xf32> to vector<32x256xf32>
    %84 = arith.addf %80, %83 : vector<32x256xf32>
    %cst_81 = arith.constant 0.000000e+00 : f32
    %85 = vector.broadcast %cst_81 : f32 to vector<32x256xf32>
    %86 = arith.maximumf %84, %85 : vector<32x256xf32>
    %c1_82 = arith.constant 1 : index
    %c2_83 = arith.constant 2 : index
    %c0_84 = arith.constant 0 : index
    %c0_85 = arith.constant 0 : index
    %87 = vector.load %arg3[%c1_82, %c2_83, %c0_84, %c0_85] : memref<2x4x32x32xbf16, #tpu.memory_space<vmem>>, vector<1x1x32x32xbf16>
    %88 = vector.shape_cast %87 : vector<1x1x32x32xbf16> to vector<32x32xbf16>
    %89 = arith.truncf %86 : vector<32x256xf32> to vector<32x256xbf16>
    %cst_86 = arith.constant dense<0.000000e+00> : vector<32x256xf32>
    %90 = tpu.matmul %88, %89, %cst_86 {dimension_numbers = #tpu.dot_dimension_numbers<[1], [0], [0], [1], [0, 0, 1, 1], [], []>} : vector<32x32xbf16>, vector<32x256xbf16>, vector<32x256xf32> -> vector<32x256xf32>
    %c1_87 = arith.constant 1 : index
    %c2_88 = arith.constant 2 : index
    %c0_89 = arith.constant 0 : index
    %c0_90 = arith.constant 0 : index
    %91 = vector.load %arg4[%c1_87, %c2_88, %c0_89, %c0_90] : memref<2x4x32x1xf32, #tpu.memory_space<vmem>>, vector<1x1x32x1xf32>
    %92 = vector.shape_cast %91 : vector<1x1x32x1xf32> to vector<32x1xf32>
    %93 = vector.broadcast %92 : vector<32x1xf32> to vector<32x256xf32>
    %94 = arith.addf %90, %93 : vector<32x256xf32>
    %cst_91 = arith.constant 0.000000e+00 : f32
    %95 = vector.broadcast %cst_91 : f32 to vector<32x256xf32>
    %96 = arith.maximumf %94, %95 : vector<32x256xf32>
    %c1_92 = arith.constant 1 : index
    %c3_93 = arith.constant 3 : index
    %c0_94 = arith.constant 0 : index
    %c0_95 = arith.constant 0 : index
    %97 = vector.load %arg3[%c1_92, %c3_93, %c0_94, %c0_95] : memref<2x4x32x32xbf16, #tpu.memory_space<vmem>>, vector<1x1x32x32xbf16>
    %98 = vector.shape_cast %97 : vector<1x1x32x32xbf16> to vector<32x32xbf16>
    %99 = arith.truncf %96 : vector<32x256xf32> to vector<32x256xbf16>
    %cst_96 = arith.constant dense<0.000000e+00> : vector<32x256xf32>
    %100 = tpu.matmul %98, %99, %cst_96 {dimension_numbers = #tpu.dot_dimension_numbers<[1], [0], [0], [1], [0, 0, 1, 1], [], []>} : vector<32x32xbf16>, vector<32x256xbf16>, vector<32x256xf32> -> vector<32x256xf32>
    %c1_97 = arith.constant 1 : index
    %c3_98 = arith.constant 3 : index
    %c0_99 = arith.constant 0 : index
    %c0_100 = arith.constant 0 : index
    %101 = vector.load %arg4[%c1_97, %c3_98, %c0_99, %c0_100] : memref<2x4x32x1xf32, #tpu.memory_space<vmem>>, vector<1x1x32x1xf32>
    %102 = vector.shape_cast %101 : vector<1x1x32x1xf32> to vector<32x1xf32>
    %103 = vector.broadcast %102 : vector<32x1xf32> to vector<32x256xf32>
    %104 = arith.addf %100, %103 : vector<32x256xf32>
    %105 = math.tanh %104 : vector<32x256xf32>
    %106 = vector.extract_strided_slice %105 {offsets = [0, 0], sizes = [8, 128], strides = [1, 1]} : vector<32x256xf32> to vector<8x128xf32>
    %c0_101 = arith.constant 0 : index
    %c0_102 = arith.constant 0 : index
    %c128 = arith.constant 128 : index
    %107 = vector.load %arg5[%c0_101, %c0_102, %c128] : memref<2x8x256xf32, #tpu.memory_space<vmem>>, vector<1x8x128xf32>
    %108 = vector.shape_cast %107 : vector<1x8x128xf32> to vector<8x128xf32>
    %109 = vector.shape_cast %106 : vector<8x128xf32> to vector<1x8x128xf32>
    tpu.vector_store %arg5[%c0_101, %c0_102, %c128], %109 {strides = array<i32>} : memref<2x8x256xf32, #tpu.memory_space<vmem>>, vector<1x8x128xf32>,
    %110 = vector.extract_strided_slice %105 {offsets = [0, 128], sizes = [8, 128], strides = [1, 1]} : vector<32x256xf32> to vector<8x128xf32>
    %c1_103 = arith.constant 1 : index
    %c0_104 = arith.constant 0 : index
    %c128_105 = arith.constant 128 : index
    %111 = vector.load %arg5[%c1_103, %c0_104, %c128_105] : memref<2x8x256xf32, #tpu.memory_space<vmem>>, vector<1x8x128xf32>
    %112 = vector.shape_cast %111 : vector<1x8x128xf32> to vector<8x128xf32>
    %113 = vector.shape_cast %110 : vector<8x128xf32> to vector<1x8x128xf32>
    tpu.vector_store %arg5[%c1_103, %c0_104, %c128_105], %113 {strides = array<i32>} : memref<2x8x256xf32, #tpu.memory_space<vmem>>, vector<1x8x128xf32>,
    return
  }
}

</mosaic_0001>

<bundles_post_ra>
// kernel: tpu_custom_call.1
= control target key start
LH: loop header
LB: loop body
LE: loop exit
PB: predicated region body
PF: predicated region fallthrough
CT: control target
= control target key end

     0   :  { %vm57_vm0 = vcmask 1043456   ;;  %v1284_v3 = vmov 0   ;;  %vm50_vm1 = vcmask 64512   ;;  %s1584_s0 = inlined_call_operand.vmem [shape: bf16[2,8,256], index: 0, kind: input, shape index: {}]   ;;  %s1585_s1 = inlined_call_operand.vmem [shape: f32[2,32,256], index: 1, kind: input, shape index: {}]   ;;  %s1586_s2 = inlined_call_operand.vmem [shape: bf16[2,32,8], index: 2, kind: input, shape index: {}]   ;;  %s1587_s3 = inlined_call_operand.vmem [shape: bf16[2,4,32,32], index: 3, kind: input, shape index: {}]   ;;  %s1588_s4 = inlined_call_operand.vmem [shape: f32[2,4,32,1], index: 4, kind: input, shape index: {}]   ;;  %s1589_s5 = inlined_call_operand.hbm [shape: f32[2,8,256], index: 5, kind: output, shape index: {}]  }
   0x1   :  { %v26_v0 = vld [vmem:[%s1584_s0] sm:$0xff]  ;;  %96 = vmatprep.mubr.bf16.mxu0 %v1284_v3  ;;  %206 = vmatprep.mubr.bf16.mxu1 %v1284_v3  ;;  %v1231_v6 = vld [vmem:[%s1586_s2 + $0x8] sm:$0xff]  }
   0x2   :  { %v1110_v1 = vcombine.high %v26_v0, %v26_v0  ;;  %v1109_v2 = vcombine.low %v26_v0, %v26_v0  ;;  %v1230_v4 = vld [vmem:[%s1586_s2] sm:$0xff]   ;;  %1226 = vset.pattern.permute.xlu0 %v1284_v3  ;;  %1227 = vset.pattern.permute.xlu1 %v1284_v3 }
   0x4   :  { %1111 = vmatprep.subr.msk.bf16.mxu0 %vm57_vm0, %v1110_v1  ;;  %v59_v5 = vsel %vm57_vm0, %v1109_v2, 0 }
   0x5   :  { %65 = vmatpush1.bf16.msra.mxu0 %v59_v5 }
   0x8   :  { %1112 = vmatmul.mubr.msk.bf16.vlgmr.msra.gmra.mrb[0].mxu0 %vm50_vm1, %v1230_v4 }
   0x9   :  { %106 = vmatprep.mubr.bf16.mxu0 %v1284_v3 }
  0x10   :  { %1113 = vmatmul.mubr.msk.bf16.gmra.mrb[4].mxu0 %vm50_vm1, %v1231_v6 }
  0x11   :  { %10 = vsyncpa [#allocation3], 0  ;;  %317 = vmatprep.mubr.bf16.mxu0 %v1284_v3  ;;  %v133_v7 = vld [vmem:[%s1588_s4] sm:$0xff]  ;;  %v135_v8 = vld [vmem:[%s1588_s4 + $0x10] sm:$0xff]  ;;  %vm167_vm2 = vcmask 261120   ;;  %s1285_s13 = smov [#allocation2]  }
  0x12   :  { %139 = vperm.xlu0 %1226, %v133_v7   ;;  %149 = vperm.xlu1 %1227, %v135_v8   ;;  %v134_v9 = vld [vmem:[%s1588_s4 + $0x8] sm:$0xff]  ;;  %v136_v10 = vld [vmem:[%s1588_s4 + $0x18] sm:$0xff]  ;;  %v1122_v11 = vld [vmem:[%s1588_s4 + $0x20] sm:$0xff]  ;;  %s1096_s14 = sshll.u32 %s1285_s13, 4  ;;  %s1097_s14 = int_to_ptr.vmem [resolvable:$true] %s1096_s14 }
  0x13   :  { %v1123_v12 = vld [vmem:[%s1588_s4 + $0x28] sm:$0xff]  ;;  %v1124_v13 = vld [vmem:[%s1588_s4 + $0x30] sm:$0xff]  ;;  %v1125_v14 = vld [vmem:[%s1588_s4 + $0x38] sm:$0xff]  ;;  %p1265_p1 = scmp.lt.s32.totalorder %s1097_s14, %s1097_s14 }
  0x14   :  { %v1134_v15 = vld [vmem:[%s1588_s4 + $0x40] sm:$0xff]  ;;  %v1135_v16 = vld [vmem:[%s1588_s4 + $0x48] sm:$0xff]  ;;  %v1136_v17 = vld [vmem:[%s1588_s4 + $0x50] sm:$0xff] }
  0x15   :  { %v1137_v18 = vld [vmem:[%s1588_s4 + $0x58] sm:$0xff]  ;;  %v1178_v19 = vld [vmem:[%s1588_s4 + $0x80] sm:$0xff]  ;;  %v1179_v20 = vld [vmem:[%s1588_s4 + $0x88] sm:$0xff] }
  0x16   :  { %144 = vperm.xlu0 %1226, %v134_v9   ;;  %154 = vperm.xlu1 %1227, %v136_v10   ;;  %v1180_v21 = vld [vmem:[%s1588_s4 + $0x90] sm:$0xff]  ;;  %v1181_v22 = vld [vmem:[%s1588_s4 + $0x98] sm:$0xff]  ;;  %v1190_v23 = vld [vmem:[%s1588_s4 + $0xa0] sm:$0xff] }
  0x17   :  { %v1191_v24 = vld [vmem:[%s1588_s4 + $0xa8] sm:$0xff]  ;;  %v1192_v25 = vld [vmem:[%s1588_s4 + $0xb0] sm:$0xff]  ;;  %v1193_v26 = vld [vmem:[%s1588_s4 + $0xb8] sm:$0xff] }
  0x18   :  { %v1202_v27 = vld [vmem:[%s1588_s4 + $0xc0] sm:$0xff]  ;;  %v1203_v28 = vld [vmem:[%s1588_s4 + $0xc8] sm:$0xff]  ;;  %v1204_v29 = vld [vmem:[%s1588_s4 + $0xd0] sm:$0xff] }
  0x19   :  { %v1205_v30 = vld [vmem:[%s1588_s4 + $0xd8] sm:$0xff]  ;;  %v1146_v31 = vld [vmem:[%s1588_s4 + $0x60] sm:$0xff]  ;;  %v28_v34 = vld [vmem:[%s1585_s1 + $0x8] sm:$0xff] }
  0x1a   :  { %251 = vperm.xlu0 %1226, %v1122_v11   ;;  %256 = vperm.xlu1 %1227, %v1123_v12   ;;  %v1214_v32 = vld [vmem:[%s1588_s4 + $0xe0] sm:$0xff]  ;;  %v29_v36 = vld [vmem:[%s1585_s1 + $0x10] sm:$0xff]  ;;  %v30_v39 = vld [vmem:[%s1585_s1 + $0x18] sm:$0xff] }
  0x1b   :  { %v27_v33 = vld [vmem:[%s1585_s1] sm:$0xff]  ;;  %v32_v50 = vld [vmem:[%s1585_s1 + $0x28] sm:$0xff]  ;;  %v33_v53 = vld [vmem:[%s1585_s1 + $0x30] sm:$0xff] }
  0x1c   :  { %v31_v49 = vld [vmem:[%s1585_s1 + $0x20] sm:$0xff]  ;;  %v34_v57 = vld [vmem:[%s1585_s1 + $0x38] sm:$0xff]  ;;  %v1233_v7 = vld [vmem:[%s1587_s3 + $0x8] sm:$0xff]  }
  0x1d   :  { %v1232_v6 = vld [vmem:[%s1587_s3] sm:$0xff]  }
  0x1e   :  { %261 = vperm.xlu0 %1226, %v1124_v13   ;;  %266 = vperm.xlu1 %1227, %v1125_v14  }
  0x22   :  { %362 = vperm.xlu0 %1226, %v1134_v15   ;;  %367 = vperm.xlu1 %1227, %v1135_v16  }
  0x26   :  { %372 = vperm.xlu0 %1226, %v1136_v17   ;;  %377 = vperm.xlu1 %1227, %v1137_v18  }
  0x2a   :  { %676 = vperm.xlu0 %1226, %v1178_v19   ;;  %681 = vperm.xlu1 %1227, %v1179_v20  }
  0x2e   :  { %686 = vperm.xlu0 %1226, %v1180_v21   ;;  %691 = vperm.xlu1 %1227, %v1181_v22  }
  0x32   :  { %787 = vperm.xlu0 %1226, %v1190_v23   ;;  %792 = vperm.xlu1 %1227, %v1191_v24  }
  0x36   :  { %797 = vperm.xlu0 %1226, %v1192_v25   ;;  %802 = vperm.xlu1 %1227, %v1193_v26  }
  0x3a   :  { %898 = vperm.xlu0 %1226, %v1202_v27   ;;  %903 = vperm.xlu1 %1227, %v1203_v28  }
  0x3e   :  { %908 = vperm.xlu0 %1226, %v1204_v29   ;;  %913 = vperm.xlu1 %1227, %v1205_v30  }
  0x42   :  { %473 = vperm.xlu0 %1226, %v1146_v31   ;;  %1009 = vperm.xlu1 %1227, %v1214_v32  }
  0x91   :  { %v140_v8 = vpop.permute.xlu0 %139  ;;  %v150_v17 = vpop.permute.xlu1 %149 }
  0x95   :  { %v145_v12 = vpop.permute.xlu0 %144  ;;  %v155_v28 = vpop.permute.xlu1 %154 }
  0xdb   :  { %v98_v35 = vpop.f32.mrb[0].mxu0 }
  0xdc   :  { %v99_v37 = vadd.f32 %v98_v35, %v27_v33  ;;  %v100_v38 = vpop.f32.mrb[1].mxu0 }
  0xdd   :  { %v101_v40 = vadd.f32 %v100_v38, %v28_v34  ;;  %v102_v41 = vpop.f32.mrb[2].mxu0 }
  0xde   :  { %v103_v42 = vadd.f32 %v102_v41, %v29_v36  ;;  %v104_v43 = vpop.f32.mrb[3].mxu0  ;;  %v117_v45 = vmax.f32 %v99_v37, 0.0  ;;  %v1235_v41 = vld [vmem:[%s1587_s3 + $0x18] sm:$0xff]  }
  0xdf   :  { %v105_v44 = vadd.f32 %v104_v43, %v30_v39  ;;  %v118_v47 = vmax.f32 %v101_v40, 0.0  ;;  %v1234_v40 = vld [vmem:[%s1587_s3 + $0x10] sm:$0xff]  }
  0xe0   :  { %v119_v46 = vmax.f32 %v103_v42, 0.0  ;;  %v252_v42 = vpop.permute.xlu0 %251 }
  0xe1   :  { %v120_v48 = vmax.f32 %v105_v44, 0.0 }
  0xe2   :  { %v129_v51 = vpack.c.bf16 %v119_v46, %v117_v45  ;;  %v257_v46 = vpop.permute.xlu1 %256 }
  0xe3   :  { %v108_v52 = vpop.f32.mrb[4].mxu0  ;;  %v130_v54 = vpack.c.bf16 %v120_v48, %v118_v47 }
  0xe4   :  { %v109_v55 = vadd.f32 %v108_v52, %v31_v49  ;;  %v110_v56 = vpop.f32.mrb[5].mxu0 }
  0xe5   :  { %v111_v58 = vadd.f32 %v110_v56, %v32_v50  ;;  %v112_v59 = vpop.f32.mrb[6].mxu0  ;;  %174 = vmatprep.subr.bf16.mxu1 %v130_v54 }
  0xe6   :  { %v113_v60 = vadd.f32 %v112_v59, %v33_v53  ;;  %v114_v61 = vpop.f32.mrb[7].mxu0  ;;  %175 = vmatpush1.bf16.msra.mxu1 %v129_v51  ;;  %v121_v63 = vmax.f32 %v109_v55, 0.0 }
  0xe7   :  { %v115_v62 = vadd.f32 %v114_v61, %v34_v57  ;;  %v122_v1 = vmax.f32 %v111_v58, 0.0  ;;  %v262_v57 = vpop.permute.xlu0 %261 }
  0xe8   :  { %v123_v0 = vmax.f32 %v113_v60, 0.0 }
  0xe9   :  { %v124_v2 = vmax.f32 %v115_v62, 0.0  ;;  %v267_v62 = vpop.permute.xlu1 %266 }
  0xea   :  { %v131_v4 = vpack.c.bf16 %v123_v0, %v121_v63 }
  0xeb   :  { %v132_v5 = vpack.c.bf16 %v124_v2, %v122_v1 }
  0xed   :  { %176 = vmatprep.subr.bf16.mxu1 %v132_v5 }
  0xee   :  { %177 = vmatpush1.bf16.msra.mxu1 %v131_v4 }
  0xf1   :  { %1116 = vmatmul.mubr.msk.bf16.vlgmr.msra.gmra.mrb[0].mxu1 %vm167_vm2, %v1232_v6 }
  0xf2   :  { %216 = vmatprep.mubr.bf16.mxu1 %v1284_v3 }
  0xf9   :  { %1117 = vmatmul.mubr.msk.bf16.gmra.mrb[4].mxu1 %vm167_vm2, %v1233_v7  ;;  %v1158_v7 = vld [vmem:[%s1584_s0 + $0x8] sm:$0xff] }
  0xfa   :  { %428 = vmatprep.mubr.bf16.mxu1 %v1284_v3 }
 0x1c4   :  { %v208_v9 = vpop.f32.mrb[0].mxu1 }
 0x1c5   :  { %v209_v10 = vadd.f32 %v208_v9, %v140_v8  ;;  %v210_v11 = vpop.f32.mrb[1].mxu1 }
 0x1c6   :  { %v211_v13 = vadd.f32 %v210_v11, %v140_v8  ;;  %v212_v14 = vpop.f32.mrb[2].mxu1 }
 0x1c7   :  { %v213_v15 = vadd.f32 %v212_v14, %v145_v12  ;;  %v214_v16 = vpop.f32.mrb[3].mxu1  ;;  %v227_v19 = vmax.f32 %v209_v10, 0.0  ;;  %v1236_v14 = vld [vmem:[%s1587_s3 + $0x20] sm:$0xff]  }
 0x1c8   :  { %v215_v18 = vadd.f32 %v214_v16, %v145_v12  ;;  %v228_v21 = vmax.f32 %v211_v13, 0.0  ;;  %v1170_v12 = vcombine.high %v1158_v7, %v1158_v7  ;;  %v1169_v13 = vcombine.low %v1158_v7, %v1158_v7  ;;  %v1239_v16 = vld [vmem:[%s1587_s3 + $0x28] sm:$0xff]  }
 0x1c9   :  { %v229_v20 = vmax.f32 %v213_v15, 0.0  ;;  %v1164_v7 = vld [vmem:[%s1585_s1 + $0x68] sm:$0xff] }
 0x1ca   :  { %v230_v22 = vmax.f32 %v215_v18, 0.0  ;;  %v594_v15 = vsel %vm57_vm0, %v1169_v13, 0  ;;  %v1241_v18 = vld [vmem:[%s1586_s2 + $0x18] sm:$0xff]  }
 0x1cb   :  { %v240_v23 = vpack.c.bf16 %v229_v20, %v227_v19  ;;  %v363_v19 = vpop.permute.xlu0 %362  ;;  %v1166_v13 = vld [vmem:[%s1585_s1 + $0x78] sm:$0xff] }
 0x1cc   :  { %v241_v24 = vpack.c.bf16 %v230_v22, %v228_v21  ;;  %v218_v25 = vpop.f32.mrb[4].mxu1 }
 0x1cd   :  { %v219_v26 = vadd.f32 %v218_v25, %v150_v17  ;;  %v220_v27 = vpop.f32.mrb[5].mxu1 }
 0x1ce   :  { %v221_v29 = vadd.f32 %v220_v27, %v150_v17  ;;  %v222_v30 = vpop.f32.mrb[6].mxu1  ;;  %285 = vmatprep.subr.bf16.mxu0 %v241_v24  ;;  %v1240_v17 = vld [vmem:[%s1586_s2 + $0x10] sm:$0xff]  }
 0x1cf   :  { %v223_v31 = vadd.f32 %v222_v30, %v155_v28  ;;  %v224_v32 = vpop.f32.mrb[7].mxu1  ;;  %286 = vmatpush1.bf16.msra.mxu0 %v240_v23  ;;  %v231_v34 = vmax.f32 %v219_v26, 0.0  ;;  %v368_v23 = vpop.permute.xlu1 %367 }
 0x1d0   :  { %v225_v33 = vadd.f32 %v224_v32, %v155_v28  ;;  %v232_v36 = vmax.f32 %v221_v29, 0.0 }
 0x1d1   :  { %v233_v35 = vmax.f32 %v223_v31, 0.0 }
 0x1d2   :  { %v234_v37 = vmax.f32 %v225_v33, 0.0 }
 0x1d3   :  { %v242_v38 = vpack.c.bf16 %v233_v35, %v231_v34  ;;  %v373_v34 = vpop.permute.xlu0 %372 }
 0x1d4   :  { %v243_v39 = vpack.c.bf16 %v234_v37, %v232_v36 }
 0x1d6   :  { %287 = vmatprep.subr.bf16.mxu0 %v243_v39  ;;  %v378_v39 = vpop.permute.xlu1 %377 }
 0x1d7   :  { %288 = vmatpush1.bf16.msra.mxu0 %v242_v38 }
 0x1da   :  { %1128 = vmatmul.mubr.msk.bf16.vlgmr.msra.gmra.mrb[8].mxu0 %vm167_vm2, %v1234_v40 }
 0x1db   :  { %327 = vmatprep.mubr.bf16.mxu0 %v1284_v3 }
 0x1e2   :  { %1129 = vmatmul.mubr.msk.bf16.gmra.mrb[12].mxu0 %vm167_vm2, %v1235_v41 }
 0x1e3   :  { %536 = vmatprep.mubr.bf16.mxu0 %v1284_v3 }
 0x2ad   :  { %v319_v43 = vpop.f32.mrb[8].mxu0 }
 0x2ae   :  { %v320_v44 = vadd.f32 %v319_v43, %v252_v42  ;;  %v321_v45 = vpop.f32.mrb[9].mxu0 }
 0x2af   :  { %v322_v47 = vadd.f32 %v321_v45, %v252_v42  ;;  %v323_v48 = vpop.f32.mrb[10].mxu0 }
 0x2b0   :  { %v324_v49 = vadd.f32 %v323_v48, %v257_v46  ;;  %v325_v50 = vpop.f32.mrb[11].mxu0  ;;  %v338_v52 = vmax.f32 %v320_v44, 0.0 }
 0x2b1   :  { %v326_v51 = vadd.f32 %v325_v50, %v257_v46  ;;  %v339_v54 = vmax.f32 %v322_v47, 0.0 }
 0x2b2   :  { %v340_v53 = vmax.f32 %v324_v49, 0.0  ;;  %v1159_v49 = vld [vmem:[%s1585_s1 + $0x40] sm:$0xff] }
 0x2b3   :  { %v341_v55 = vmax.f32 %v326_v51, 0.0  ;;  %v1160_v51 = vld [vmem:[%s1585_s1 + $0x48] sm:$0xff] }
 0x2b4   :  { %v351_v56 = vpack.c.bf16 %v340_v53, %v338_v52 }
 0x2b5   :  { %v352_v58 = vpack.c.bf16 %v341_v55, %v339_v54  ;;  %v329_v59 = vpop.f32.mrb[12].mxu0  ;;  %v1161_v54 = vld [vmem:[%s1585_s1 + $0x50] sm:$0xff] }
 0x2b6   :  { %v330_v60 = vadd.f32 %v329_v59, %v262_v57  ;;  %v331_v61 = vpop.f32.mrb[13].mxu0 }
 0x2b7   :  { %v332_v63 = vadd.f32 %v331_v61, %v262_v57  ;;  %v333_v0 = vpop.f32.mrb[14].mxu0  ;;  %396 = vmatprep.subr.bf16.mxu1 %v352_v58  ;;  %v1162_v57 = vld [vmem:[%s1585_s1 + $0x58] sm:$0xff] }
 0x2b8   :  { %v334_v1 = vadd.f32 %v333_v0, %v267_v62  ;;  %v335_v2 = vpop.f32.mrb[15].mxu0  ;;  %397 = vmatpush1.bf16.msra.mxu1 %v351_v56  ;;  %v342_v5 = vmax.f32 %v330_v60, 0.0  ;;  %v1242_v60 = vld [vmem:[%s1587_s3 + $0x30] sm:$0xff]  }
 0x2b9   :  { %v336_v4 = vadd.f32 %v335_v2, %v267_v62  ;;  %v343_v8 = vmax.f32 %v332_v63, 0.0 }
 0x2ba   :  { %v344_v6 = vmax.f32 %v334_v1, 0.0 }
 0x2bb   :  { %v345_v9 = vmax.f32 %v336_v4, 0.0 }
 0x2bc   :  { %v353_v10 = vpack.c.bf16 %v344_v6, %v342_v5  ;;  %v1163_v5 = vld [vmem:[%s1585_s1 + $0x60] sm:$0xff] }
 0x2bd   :  { %v354_v11 = vpack.c.bf16 %v345_v9, %v343_v8 }
 0x2bf   :  { %398 = vmatprep.subr.bf16.mxu1 %v354_v11 }
 0x2c0   :  { %399 = vmatpush1.bf16.msra.mxu1 %v353_v10  ;;  %v1165_v10 = vld [vmem:[%s1585_s1 + $0x70] sm:$0xff] }
 0x2c1   :  { %1171 = vmatprep.subr.msk.bf16.mxu1 %vm57_vm0, %v1170_v12 }
 0x2c3   :  { %1140 = vmatmul.mubr.msk.bf16.vlgmr.msra.gmra.mrb[8].mxu1 %vm167_vm2, %v1236_v14 }
 0x2c4   :  { %600 = vmatpush1.bf16.msra.mxu1 %v594_v15  ;;  %438 = vmatprep.mubr.bf16.mxu1 %v1284_v3 }
 0x2cb   :  { %1141 = vmatmul.mubr.msk.bf16.gmra.mrb[12].mxu1 %vm167_vm2, %v1239_v16  ;;  %v1243_v16 = vld [vmem:[%s1587_s3 + $0x38] sm:$0xff]  }
 0x2cc   :  { %631 = vmatprep.mubr.bf16.mxu1 %v1284_v3 }
 0x2d3   :  { %1172 = vmatmul.mubr.msk.bf16.vlgmr.msra.gmra.mrb[16].mxu1 %vm50_vm1, %v1240_v17 }
 0x2d4   :  { %641 = vmatprep.mubr.bf16.mxu1 %v1284_v3 }
 0x2db   :  { %1173 = vmatmul.mubr.msk.bf16.gmra.mrb[20].mxu1 %vm50_vm1, %v1241_v18 }
 0x2dc   :  { %853 = vmatprep.mubr.bf16.mxu1 %v1284_v3 }
 0x396   :  { %v430_v20 = vpop.f32.mrb[8].mxu1 }
 0x397   :  { %v431_v21 = vadd.f32 %v430_v20, %v363_v19  ;;  %v432_v22 = vpop.f32.mrb[9].mxu1 }
 0x398   :  { %v433_v24 = vadd.f32 %v432_v22, %v363_v19  ;;  %v434_v25 = vpop.f32.mrb[10].mxu1 }
 0x399   :  { %v435_v26 = vadd.f32 %v434_v25, %v368_v23  ;;  %v436_v27 = vpop.f32.mrb[11].mxu1  ;;  %v449_v29 = vmax.f32 %v431_v21, 0.0 }
 0x39a   :  { %v437_v28 = vadd.f32 %v436_v27, %v368_v23  ;;  %v450_v31 = vmax.f32 %v433_v24, 0.0  ;;  %v1245_v27 = vld [vmem:[%s1587_s3 + $0x48] sm:$0xff]  }
 0x39b   :  { %v451_v30 = vmax.f32 %v435_v26, 0.0  ;;  %v1244_v26 = vld [vmem:[%s1587_s3 + $0x40] sm:$0xff]  }
 0x39c   :  { %v452_v32 = vmax.f32 %v437_v28, 0.0  ;;  %v677_v28 = vpop.permute.xlu0 %676 }
 0x39d   :  { %v462_v33 = vpack.c.bf16 %v451_v30, %v449_v29 }
 0x39e   :  { %v463_v35 = vpack.c.bf16 %v452_v32, %v450_v31  ;;  %v440_v36 = vpop.f32.mrb[12].mxu1 }
 0x39f   :  { %v441_v37 = vadd.f32 %v440_v36, %v373_v34  ;;  %v442_v38 = vpop.f32.mrb[13].mxu1 }
 0x3a0   :  { %v443_v40 = vadd.f32 %v442_v38, %v373_v34  ;;  %v444_v41 = vpop.f32.mrb[14].mxu1  ;;  %504 = vmatprep.subr.bf16.mxu0 %v463_v35  ;;  %v687_v29 = vpop.permute.xlu0 %686 }
 0x3a1   :  { %v445_v42 = vadd.f32 %v444_v41, %v378_v39  ;;  %v446_v43 = vpop.f32.mrb[15].mxu1  ;;  %505 = vmatpush1.bf16.msra.mxu0 %v462_v33  ;;  %v453_v45 = vmax.f32 %v441_v37, 0.0 }
 0x3a2   :  { %v447_v44 = vadd.f32 %v446_v43, %v378_v39  ;;  %v454_v47 = vmax.f32 %v443_v40, 0.0 }
 0x3a3   :  { %v455_v46 = vmax.f32 %v445_v42, 0.0 }
 0x3a4   :  { %v456_v48 = vmax.f32 %v447_v44, 0.0  ;;  %v1528_v30 = vpop.permute.xlu0 %787 }
 0x3a5   :  { %v464_v50 = vpack.c.bf16 %v455_v46, %v453_v45 }
 0x3a6   :  { %v465_v52 = vpack.c.bf16 %v456_v48, %v454_v47  ;;  %v633_v53 = vpop.f32.mrb[16].mxu1 }
 0x3a7   :  { %v634_v55 = vadd.f32 %v1159_v49, %v633_v53  ;;  %v635_v56 = vpop.f32.mrb[17].mxu1 }
 0x3a8   :  { %v636_v58 = vadd.f32 %v1160_v51, %v635_v56  ;;  %506 = vmatprep.subr.bf16.mxu0 %v465_v52  ;;  %v637_v59 = vpop.f32.mrb[18].mxu1  ;;  %v1530_v31 = vpop.permute.xlu0 %797 }
 0x3a9   :  { %v638_v61 = vadd.f32 %v1161_v54, %v637_v59  ;;  %507 = vmatpush1.bf16.msra.mxu0 %v464_v50  ;;  %v639_v62 = vpop.f32.mrb[19].mxu1  ;;  %v652_v0 = vmax.f32 %v634_v55, 0.0  ;;  %v682_v50 = vpop.permute.xlu1 %681 }
 0x3aa   :  { %v640_v63 = vadd.f32 %v1162_v57, %v639_v62  ;;  %v653_v2 = vmax.f32 %v636_v58, 0.0 }
 0x3ab   :  { %v654_v1 = vmax.f32 %v638_v61, 0.0 }
 0x3ac   :  { %v655_v4 = vmax.f32 %v640_v63, 0.0  ;;  %1152 = vmatmul.mubr.msk.bf16.vlgmr.msra.gmra.mrb[16].mxu0 %vm167_vm2, %v1242_v60  ;;  %v1532_v32 = vpop.permute.xlu0 %898 }
 0x3ad   :  { %v665_v6 = vpack.c.bf16 %v654_v1, %v652_v0  ;;  %544 = vmatprep.mubr.bf16.mxu0 %v1284_v3  ;;  %v692_v1 = vpop.permute.xlu1 %691 }
 0x3ae   :  { %v666_v8 = vpack.c.bf16 %v655_v4, %v653_v2  ;;  %v643_v9 = vpop.f32.mrb[20].mxu1 }
 0x3af   :  { %v644_v11 = vadd.f32 %v1163_v5, %v643_v9  ;;  %v645_v12 = vpop.f32.mrb[21].mxu1 }
 0x3b0   :  { %v646_v14 = vadd.f32 %v1164_v7, %v645_v12  ;;  %v647_v15 = vpop.f32.mrb[22].mxu1  ;;  %710 = vmatprep.subr.bf16.mxu0 %v666_v8  ;;  %v1534_v33 = vpop.permute.xlu0 %908 }
 0x3b1   :  { %v648_v17 = vadd.f32 %v1165_v10, %v647_v15  ;;  %v649_v18 = vpop.f32.mrb[23].mxu1  ;;  %711 = vmatpush1.bf16.msra.mxu0 %v665_v6  ;;  %v656_v20 = vmax.f32 %v644_v11, 0.0  ;;  %v1247_v15 = vld [vmem:[%s1587_s3 + $0x58] sm:$0xff]  }
 0x3b2   :  { %v650_v19 = vadd.f32 %v1166_v13, %v649_v18  ;;  %v657_v22 = vmax.f32 %v646_v14, 0.0  ;;  %v1246_v14 = vld [vmem:[%s1587_s3 + $0x50] sm:$0xff]  }
 0x3b3   :  { %v658_v21 = vmax.f32 %v648_v17, 0.0 }
 0x3b4   :  { %v659_v23 = vmax.f32 %v650_v19, 0.0  ;;  %1153 = vmatmul.mubr.msk.bf16.gmra.mrb[20].mxu0 %vm167_vm2, %v1243_v16  ;;  %v474_v34 = vpop.permute.xlu0 %473  ;;  %v793_v19 = vpop.permute.xlu1 %792 }
 0x3b5   :  { %v667_v24 = vpack.c.bf16 %v658_v21, %v656_v20  ;;  %742 = vmatprep.mubr.bf16.mxu0 %v1284_v3 }
 0x3b6   :  { %v668_v25 = vpack.c.bf16 %v659_v23, %v657_v22 }
 0x3b8   :  { %712 = vmatprep.subr.bf16.mxu0 %v668_v25 }
 0x3b9   :  { %713 = vmatpush1.bf16.msra.mxu0 %v667_v24 }
 0x3bc   :  { %1184 = vmatmul.mubr.msk.bf16.vlgmr.msra.gmra.mrb[24].mxu0 %vm167_vm2, %v1244_v26 }
 0x3bd   :  { %752 = vmatprep.mubr.bf16.mxu0 %v1284_v3 }
 0x3c4   :  { %1185 = vmatmul.mubr.msk.bf16.gmra.mrb[28].mxu0 %vm167_vm2, %v1245_v27 }
 0x3c5   :  { %964 = vmatprep.mubr.bf16.mxu0 %v1284_v3 }
 0x47f   :  { %v538_v35 = vpop.f32.mrb[16].mxu0 }
 0x480   :  { %v539_v36 = vadd.f32 %v538_v35, %v474_v34  ;;  %v540_v37 = vpop.f32.mrb[17].mxu0 }
 0x481   :  { %v541_v38 = vadd.f32 %v540_v37, %v474_v34  ;;  %v542_v39 = vpop.f32.mrb[18].mxu0 }
 0x482   :  { %1252 = vtanh.f32 %v539_v36  ;;  %v543_v40 = vpop.f32.mrb[19].mxu0 }
 0x483   :  { %1254 = vtanh.f32 %v541_v38  ;;  %v803_v38 = vpop.permute.xlu1 %802 }
 0x487   :  { %v546_v41 = vpop.f32.mrb[20].mxu0 }
 0x488   :  { %v547_v42 = vpop.f32.mrb[21].mxu0 }
 0x489   :  { %v548_v43 = vpop.f32.mrb[22].mxu0 }
 0x48a   :  { %v549_v44 = vpop.f32.mrb[23].mxu0 }
 0x48c   :  { %v1253_v45 = vpop.eup %1252 }
 0x48d   :  { %v1255_v46 = vpop.eup %1254  ;;  %553 = vst [vmem:[#allocation2] sm:$0xff] %v1253_v45 }
 0x48e   :  { %555 = vst [vmem:[#allocation2 + $0x10] sm:$0xff] %v1255_v46 }
 0x48f   :  { %v744_v47 = vpop.f32.mrb[24].mxu0 }
 0x490   :  { %v745_v48 = vadd.f32 %v744_v47, %v677_v28  ;;  %v746_v49 = vpop.f32.mrb[25].mxu0 }
 0x491   :  { %v747_v51 = vadd.f32 %v746_v49, %v677_v28  ;;  %v748_v52 = vpop.f32.mrb[26].mxu0  ;;  %v1248_v49 = vld [vmem:[%s1587_s3 + $0x60] sm:$0xff]  }
 0x492   :  { %v749_v53 = vadd.f32 %v748_v52, %v682_v50  ;;  %v750_v54 = vpop.f32.mrb[27].mxu0  ;;  %v763_v56 = vmax.f32 %v745_v48, 0.0 }
 0x493   :  { %v751_v55 = vadd.f32 %v750_v54, %v682_v50  ;;  %v764_v58 = vmax.f32 %v747_v51, 0.0 }
 0x494   :  { %v765_v57 = vmax.f32 %v749_v53, 0.0  ;;  %v904_v53 = vpop.permute.xlu1 %903 }
 0x495   :  { %v766_v59 = vmax.f32 %v751_v55, 0.0 }
 0x496   :  { %v776_v60 = vpack.c.bf16 %v765_v57, %v763_v56 }
 0x497   :  { %v777_v61 = vpack.c.bf16 %v766_v59, %v764_v58  ;;  %v754_v62 = vpop.f32.mrb[28].mxu0 }
 0x498   :  { %v755_v63 = vadd.f32 %v754_v62, %v687_v29  ;;  %v756_v0 = vpop.f32.mrb[29].mxu0 }
 0x499   :  { %v757_v2 = vadd.f32 %v756_v0, %v687_v29  ;;  %v758_v4 = vpop.f32.mrb[30].mxu0  ;;  %821 = vmatprep.subr.bf16.mxu1 %v777_v61 }
 0x49a   :  { %v759_v5 = vadd.f32 %v758_v4, %v692_v1  ;;  %v760_v6 = vpop.f32.mrb[31].mxu0  ;;  %822 = vmatpush1.bf16.msra.mxu1 %v776_v60  ;;  %v767_v8 = vmax.f32 %v755_v63, 0.0 }
 0x49b   :  { %v761_v7 = vadd.f32 %v760_v6, %v692_v1  ;;  %v768_v10 = vmax.f32 %v757_v2, 0.0 }
 0x49c   :  { %v769_v9 = vmax.f32 %v759_v5, 0.0  ;;  %v914_v5 = vpop.permute.xlu1 %913 }
 0x49d   :  { %v770_v11 = vmax.f32 %v761_v7, 0.0 }
 0x49e   :  { %v778_v12 = vpack.c.bf16 %v769_v9, %v767_v8 }
 0x49f   :  { %v779_v13 = vpack.c.bf16 %v770_v11, %v768_v10 }
 0x4a1   :  { %823 = vmatprep.subr.bf16.mxu1 %v779_v13 }
 0x4a2   :  { %824 = vmatpush1.bf16.msra.mxu1 %v778_v12 }
 0x4a5   :  { %1196 = vmatmul.mubr.msk.bf16.vlgmr.msra.gmra.mrb[24].mxu1 %vm167_vm2, %v1246_v14 }
 0x4a6   :  { %863 = vmatprep.mubr.bf16.mxu1 %v1284_v3 }
 0x4ad   :  { %1197 = vmatmul.mubr.msk.bf16.gmra.mrb[28].mxu1 %vm167_vm2, %v1247_v15 }
 0x4ae   :  { %1072 = vmatprep.mubr.bf16.mxu1 %v1284_v3 }
 0x578   :  { %v855_v16 = vpop.f32.mrb[24].mxu1 }
 0x579   :  { %v856_v17 = vadd.f32 %v855_v16, %v1528_v30  ;;  %v857_v18 = vpop.f32.mrb[25].mxu1  ;;  %v1250_v16 = vld [vmem:[%s1587_s3 + $0x70] sm:$0xff]  }
 0x57a   :  { %v858_v20 = vadd.f32 %v857_v18, %v1528_v30  ;;  %v859_v21 = vpop.f32.mrb[26].mxu1 }
 0x57b   :  { %v860_v22 = vadd.f32 %v859_v21, %v793_v19  ;;  %v861_v23 = vpop.f32.mrb[27].mxu1  ;;  %v874_v25 = vmax.f32 %v856_v17, 0.0  ;;  %v1010_v17 = vpop.permute.xlu1 %1009 }
 0x57c   :  { %v862_v24 = vadd.f32 %v861_v23, %v793_v19  ;;  %v875_v27 = vmax.f32 %v858_v20, 0.0 }
 0x57d   :  { %v876_v26 = vmax.f32 %v860_v22, 0.0 }
 0x57e   :  { %v877_v28 = vmax.f32 %v862_v24, 0.0 }
 0x57f   :  { %v887_v29 = vpack.c.bf16 %v876_v26, %v874_v25 }
 0x580   :  { %v888_v34 = vpack.c.bf16 %v877_v28, %v875_v27  ;;  %v865_v35 = vpop.f32.mrb[28].mxu1 }
 0x581   :  { %v866_v36 = vadd.f32 %v865_v35, %v1530_v31  ;;  %v867_v37 = vpop.f32.mrb[29].mxu1 }
 0x582   :  { %v868_v39 = vadd.f32 %v867_v37, %v1530_v31  ;;  %v869_v40 = vpop.f32.mrb[30].mxu1  ;;  %932 = vmatprep.subr.bf16.mxu0 %v888_v34  ;;  %v1249_v31 = vld [vmem:[%s1587_s3 + $0x68] sm:$0xff]  }
 0x583   :  { %v870_v30 = vadd.f32 %v869_v40, %v803_v38  ;;  %v871_v41 = vpop.f32.mrb[31].mxu1  ;;  %933 = vmatpush1.bf16.msra.mxu0 %v887_v29  ;;  %v878_v43 = vmax.f32 %v866_v36, 0.0 }
 0x584   :  { %v872_v42 = vadd.f32 %v871_v41, %v803_v38  ;;  %v879_v45 = vmax.f32 %v868_v39, 0.0 }
 0x585   :  { %v880_v44 = vmax.f32 %v870_v30, 0.0 }
 0x586   :  { %v881_v46 = vmax.f32 %v872_v42, 0.0 }
 0x587   :  { %v889_v47 = vpack.c.bf16 %v880_v44, %v878_v43 }
 0x588   :  { %v890_v48 = vpack.c.bf16 %v881_v46, %v879_v45 }
 0x58a   :  { %934 = vmatprep.subr.bf16.mxu0 %v890_v48 }
 0x58b   :  { %935 = vmatpush1.bf16.msra.mxu0 %v889_v47 }
 0x58e   :  { %1208 = vmatmul.mubr.msk.bf16.vlgmr.msra.gmra.mrb[32].mxu0 %vm167_vm2, %v1248_v49 }
 0x58f   :  { %974 = vmatprep.mubr.bf16.mxu0 %v1284_v3 }
 0x596   :  { %1209 = vmatmul.mubr.msk.bf16.gmra.mrb[36].mxu0 %vm167_vm2, %v1249_v31 }
 0x661   :  { %v966_v50 = vpop.f32.mrb[32].mxu0 }
 0x662   :  { %v967_v51 = vadd.f32 %v966_v50, %v1532_v32  ;;  %v968_v52 = vpop.f32.mrb[33].mxu0 }
 0x663   :  { %v969_v54 = vadd.f32 %v968_v52, %v1532_v32  ;;  %v970_v55 = vpop.f32.mrb[34].mxu0 }
 0x664   :  { %v971_v56 = vadd.f32 %v970_v55, %v904_v53  ;;  %v972_v57 = vpop.f32.mrb[35].mxu0  ;;  %v985_v59 = vmax.f32 %v967_v51, 0.0 }
 0x665   :  { %v973_v58 = vadd.f32 %v972_v57, %v904_v53  ;;  %v986_v61 = vmax.f32 %v969_v54, 0.0 }
 0x666   :  { %v987_v60 = vmax.f32 %v971_v56, 0.0 }
 0x667   :  { %v988_v62 = vmax.f32 %v973_v58, 0.0 }
 0x668   :  { %v998_v63 = vpack.c.bf16 %v987_v60, %v985_v59 }
 0x669   :  { %v999_v0 = vpack.c.bf16 %v988_v62, %v986_v61  ;;  %v976_v1 = vpop.f32.mrb[36].mxu0 }
 0x66a   :  { %v977_v2 = vadd.f32 %v976_v1, %v1534_v33  ;;  %v978_v4 = vpop.f32.mrb[37].mxu0 }
 0x66b   :  { %v979_v6 = vadd.f32 %v978_v4, %v1534_v33  ;;  %v980_v7 = vpop.f32.mrb[38].mxu0  ;;  %1040 = vmatprep.subr.bf16.mxu1 %v999_v0  ;;  %v1251_v33 = vld [vmem:[%s1587_s3 + $0x78] sm:$0xff]   ;;  %s1260_s3 = scalar_lea.vmem %s1097_s14, 512 }
 0x66c   :  { %v981_v32 = vadd.f32 %v980_v7, %v914_v5  ;;  %v982_v8 = vpop.f32.mrb[39].mxu0  ;;  %1041 = vmatpush1.bf16.msra.mxu1 %v998_v63  ;;  %v989_v10 = vmax.f32 %v977_v2, 0.0  ;;  %p1261_p0 = scmp.ne.s32.totalorder %s1097_s14, %s1260_s3  ;;  %p1266_p2 = scmp.lt.s32.totalorder %s1260_s3, %s1260_s3 }
 0x66d   :  { %v983_v9 = vadd.f32 %v982_v8, %v914_v5  ;;  %v990_v12 = vmax.f32 %v979_v6, 0.0 }
 0x66e   :  { %v991_v11 = vmax.f32 %v981_v32, 0.0  ;;  %p1267_p3 = por %p1266_p2, %p1265_p1 }
 0x66f   :  { %v992_v13 = vmax.f32 %v983_v9, 0.0 }
 0x670   :  { %v1000_v14 = vpack.c.bf16 %v991_v11, %v989_v10  ;;  %p1268_p4 = pnand %p1267_p3, %p1261_p0 }
 0x671   :  { %v1001_v15 = vpack.c.bf16 %v992_v13, %v990_v12 }
 0x673   :  { %1042 = vmatprep.subr.bf16.mxu1 %v1001_v15 }
 0x674   :  { %1043 = vmatpush1.bf16.msra.mxu1 %v1000_v14 }
 0x677   :  { %1220 = vmatmul.mubr.msk.bf16.vlgmr.msra.gmra.mrb[32].mxu1 %vm167_vm2, %v1250_v16 }
 0x678   :  { %1080 = vmatprep.mubr.bf16.mxu1 %v1284_v3 }
 0x67f   :  { %1221 = vmatmul.mubr.msk.bf16.gmra.mrb[36].mxu1 %vm167_vm2, %v1251_v33 }
 0x74a   :  { %v1074_v18 = vpop.f32.mrb[32].mxu1 }
 0x74b   :  { %v1075_v19 = vadd.f32 %v1074_v18, %v1010_v17  ;;  %v1076_v20 = vpop.f32.mrb[33].mxu1 }
 0x74c   :  { %v1077_v21 = vadd.f32 %v1076_v20, %v1010_v17  ;;  %v1078_v22 = vpop.f32.mrb[34].mxu1 }
 0x74d   :  { %1256 = vtanh.f32 %v1075_v19  ;;  %v1079_v23 = vpop.f32.mrb[35].mxu1 }
 0x74e   :  { %1258 = vtanh.f32 %v1077_v21 }
 0x752   :  { %v1082_v24 = vpop.f32.mrb[36].mxu1 }
 0x753   :  { %v1083_v25 = vpop.f32.mrb[37].mxu1 }
 0x754   :  { %v1084_v3 = vpop.f32.mrb[38].mxu1 }
 0x755   :  { %v1085_v26 = vpop.f32.mrb[39].mxu1 }
 0x757   :  { %v1257_v27 = vpop.eup %1256 }
 0x758   :  { %v1259_v28 = vpop.eup %1258  ;;  %1089 = vst [vmem:[#allocation2 + $0x8] sm:$0xff] %v1257_v27 }
 0x759   :  { %1090 = vst [vmem:[#allocation2 + $0x18] sm:$0xff] %v1259_v28 }
 0x75a   :  { %1271 = shalt.err (!%p1268_p4)
}
 0x75b   :  { %s1272_s17 = scalar_lea.hbm %s1589_s5, 512 }
 0x75c   :  { %p1273_p5 = scmp.ne.s32.totalorder %s1589_s5, %s1272_s17  ;;  %p1276_p6 = scmp.lt.u32.totalorder %s1272_s17, %s1589_s5 }
 0x75e   :  { %p1278_p7 = pnand %p1276_p6, %p1273_p5 }
 0x760   :  { %1281 = shalt.err (!%p1278_p7)
}
 0x761   :  { %s1286_s22 = smov 256   ;;  %s1287_s23 = smov 16  }
 0x762   :  { %1102 = dma.vmem_to_hbm [thread:$0]  %s1097_s14, 512, %s1589_s5, [#allocation3], %s1286_s22, %s1286_s22, %s1287_s23  }
 0x763   :  { %1282 = dma.done.wait [#allocation3], 512  }
 0x764   :  { %1283 = vsyncadd [#allocation3], 4294966784 }
 0x765   :  { %1106 = vsyncpa [#allocation3], 1 }

</bundles_post_ra>
